<compile_context>
chip_gen: v6e
topology: v6e:2x2x1
jax: 0.10.0
libtpu: 0.0.40
codegen_flags: <defaults>
</compile_context>

<pallas_src>
import jax
import jax.numpy as jnp
from jax.experimental import pallas as pl
from jax.experimental.pallas import tpu as pltpu

LANE = 128


def _round_up(x, m):
    return (x + m - 1) // m * m


def mlp_kernel(x_ref, w1_ref, b1_ref, w2_ref, b2_ref, w3_ref, b3_ref, o_ref):
    # Matmul operands in bf16 (MXU-native), accumulate in f32; all VPU
    # elementwise work (bias add, ReLU) stays on the f32 accumulator.
    x = x_ref[...].astype(jnp.bfloat16)
    h1 = jnp.dot(x, w1_ref[...], preferred_element_type=jnp.float32)
    h1 = jnp.maximum(h1 + b1_ref[...], 0.0)
    h2 = jnp.dot(h1.astype(jnp.bfloat16), w2_ref[...],
                 preferred_element_type=jnp.float32)
    h2 = jnp.maximum(h2 + b2_ref[...], 0.0)
    # fc3: true-width (16-lane) output, no padding -> minimal HBM writeback.
    o_ref[...] = jnp.dot(h2.astype(jnp.bfloat16), w3_ref[...],
                         preferred_element_type=jnp.float32) + b3_ref[...]


def prepare_params(w1, b1, w2, b2, w3, b3):
    """One-time parameter prep (hoisted out of the forward path).

    Takes PyTorch-layout params (weight: (out, in), bias: (out,)) and returns:
      - weights transposed to (in, out) so the kernel computes x @ W + b
      - hidden lane dims zero-padded 100->128, 50->128 (math stays exact)
      - matmul weights cast to bf16; biases kept f32
      - output width (16) NOT padded (true-width output store).
    """
    in_f, h1_f = w1.shape[1], w1.shape[0]
    h2_f = w2.shape[0]
    out_f = w3.shape[0]
    h1_p = _round_up(h1_f, LANE)
    h2_p = _round_up(h2_f, LANE)

    w1p = (jnp.zeros((in_f, h1_p), jnp.float32)
           .at[:, :h1_f].set(w1.T).astype(jnp.bfloat16))
    b1p = jnp.zeros((1, h1_p), jnp.float32).at[:, :h1_f].set(b1[None, :])
    w2p = (jnp.zeros((h1_p, h2_p), jnp.float32)
           .at[:h1_f, :h2_f].set(w2.T).astype(jnp.bfloat16))
    b2p = jnp.zeros((1, h2_p), jnp.float32).at[:, :h2_f].set(b2[None, :])
    w3p = (jnp.zeros((h2_p, out_f), jnp.float32)
           .at[:h2_f, :].set(w3.T).astype(jnp.bfloat16))
    b3p = b3[None, :].astype(jnp.float32)
    return w1p, b1p, w2p, b2p, w3p, b3p


def test_module_forward(x, params, *, tm_max=2048):
    """Forward pass of TestModule as one fused Pallas kernel.

    x:      (batch, in_features) f32
    params: output of prepare_params()
    Returns (batch, out_features) f32.
    """
    w1p, b1p, w2p, b2p, w3p, b3p = params
    batch, in_features = x.shape
    h1_p = w1p.shape[1]
    h2_p = w2p.shape[1]
    out_f = w3p.shape[1]

    # Batch tile: big tiles amortize the ~0.35us per-grid-step overhead; when
    # there is enough work, force >= 2 grid steps so v7x's second TensorCore
    # is used ("parallel" axis).  No explicit batch padding: Pallas masks the
    # partial last block.
    if batch <= 8:
        tm = _round_up(batch, 8)
    else:
        n_steps = max(2, pl.cdiv(batch, tm_max))
        tm = _round_up(pl.cdiv(batch, n_steps), 8)
    grid = (pl.cdiv(batch, tm),)
    # TODO(synk): for very large tm, sub-chunk the batch tile in-kernel
    # (lax.fori_loop over pl.ds slices) to avoid large f32 h1/h2 temporaries.

    # True (unpadded) work estimate for XLA's scheduler.
    flops = 2 * batch * (in_features * 100 + 100 * 50 + 50 * out_f)
    bytes_accessed = (
        x.size * x.dtype.itemsize
        + sum(p.size * p.dtype.itemsize for p in params)
        + batch * out_f * 4
    )

    out = pl.pallas_call(
        mlp_kernel,
        out_shape=jax.ShapeDtypeStruct((batch, out_f), jnp.float32),
        grid_spec=pl.GridSpec(
            grid=grid,
            in_specs=[
                # x: tiled over batch, double-buffered by the pipeline.
                pl.BlockSpec((tm, in_features), lambda i: (i, 0)),
                # Weights / biases: constant index_map -> VMEM-resident.
                pl.BlockSpec((in_features, h1_p), lambda i: (0, 0)),
                pl.BlockSpec((1, h1_p), lambda i: (0, 0)),
                pl.BlockSpec((h1_p, h2_p), lambda i: (0, 0)),
                pl.BlockSpec((1, h2_p), lambda i: (0, 0)),
                pl.BlockSpec((h2_p, out_f), lambda i: (0, 0)),
                pl.BlockSpec((1, out_f), lambda i: (0, 0)),
            ],
            out_specs=pl.BlockSpec((tm, out_f), lambda i: (i, 0)),
        ),
        compiler_params=pltpu.CompilerParams(
            dimension_semantics=("parallel",),  # shards batch across v7x's 2 TCs
        ),
        cost_estimate=pl.CostEstimate(
            flops=flops, transcendentals=0, bytes_accessed=bytes_accessed
        ),
    )(x, w1p, b1p, w2p, b2p, w3p, b3p)
    return out


def init_linear_params(key, in_features, out_features):
    """PyTorch nn.Linear-style init: weight (out, in), bias (out,),
    both uniform(-1/sqrt(in), 1/sqrt(in))."""
    k_w, k_b = jax.random.split(key)
    bound = 1.0 / (in_features ** 0.5)
    w = jax.random.uniform(
        k_w, (out_features, in_features), jnp.float32, minval=-bound, maxval=bound
    )
    b = jax.random.uniform(
        k_b, (out_features,), jnp.float32, minval=-bound, maxval=bound
    )
    return w, b


if __name__ == "__main__":
    input_features = 32
    output_features = 16
    batch = 8

    root = jax.random.PRNGKey(0)
    k_x, k1, k2, k3 = jax.random.split(root, 4)

    x = jax.random.normal(k_x, (batch, input_features), jnp.float32)
    w1, b1 = init_linear_params(k1, input_features, 100)
    w2, b2 = init_linear_params(k2, 100, 50)
    w3, b3 = init_linear_params(k3, 50, output_features)

    # One-time parameter prep (pad / transpose / bf16 cast), reused every call.
    params = prepare_params(w1, b1, w2, b2, w3, b3)

    out = test_module_forward(x, params)
    out = jax.block_until_ready(out)

    # Reference in plain JAX f32 (same math as the PyTorch forward).
    ref = jnp.maximum(x @ w1.T + b1[None, :], 0.0)
    ref = jnp.maximum(ref @ w2.T + b2[None, :], 0.0)
    ref = ref @ w3.T + b3[None, :]

    assert out.shape == (batch, output_features)
    # bf16 matmul operands (f32 accumulation) -> loosened tolerance vs f32 ref.
    assert jnp.allclose(out, ref, atol=2e-2, rtol=2e-2), (
        float(jnp.max(jnp.abs(out - ref)))
    )

    print("KERNEL_OK")
</pallas_src>

<mosaic_0001>
module attributes {stable_mosaic.version = 11 : i64} {
  func.func @mlp_kernel(%arg0: i32, %arg1: memref<8x32xf32, #tpu.memory_space<vmem>>, %arg2: memref<32x128xbf16, #tpu.memory_space<vmem>>, %arg3: memref<1x128xf32, #tpu.memory_space<vmem>>, %arg4: memref<128x128xbf16, #tpu.memory_space<vmem>>, %arg5: memref<1x128xf32, #tpu.memory_space<vmem>>, %arg6: memref<128x16xbf16, #tpu.memory_space<vmem>>, %arg7: memref<1x16xf32, #tpu.memory_space<vmem>>, %arg8: memref<8x16xf32, #tpu.memory_space<vmem>>) attributes {dimension_semantics = [#tpu.dimension_semantics<parallel>], iteration_bounds = array<i64: 1>, scalar_prefetch = 0 : i64, scratch_operands = 0 : i64, tpu.core_type = #tpu.core_type<tc>, window_params = [{transform_indices = @transform_0, window_bounds = array<i64: 8, 32>}, {pipeline_mode = #tpu.pipeline_mode<synchronous>, transform_indices = @transform_1, window_bounds = array<i64: 32, 128>}, {pipeline_mode = #tpu.pipeline_mode<synchronous>, transform_indices = @transform_2, window_bounds = array<i64: 1, 128>}, {pipeline_mode = #tpu.pipeline_mode<synchronous>, transform_indices = @transform_3, window_bounds = array<i64: 128, 128>}, {pipeline_mode = #tpu.pipeline_mode<synchronous>, transform_indices = @transform_4, window_bounds = array<i64: 1, 128>}, {pipeline_mode = #tpu.pipeline_mode<synchronous>, transform_indices = @transform_5, window_bounds = array<i64: 128, 16>}, {pipeline_mode = #tpu.pipeline_mode<synchronous>, transform_indices = @transform_6, window_bounds = array<i64: 1, 16>}, {transform_indices = @transform_7, window_bounds = array<i64: 8, 16>}]} {
    %c0 = arith.constant 0 : index
    %c0_0 = arith.constant 0 : index
    %0 = vector.load %arg1[%c0, %c0_0] : memref<8x32xf32, #tpu.memory_space<vmem>>, vector<8x32xf32>
    %1 = arith.truncf %0 : vector<8x32xf32> to vector<8x32xbf16>
    %c0_1 = arith.constant 0 : index
    %c0_2 = arith.constant 0 : index
    %2 = vector.load %arg2[%c0_1, %c0_2] : memref<32x128xbf16, #tpu.memory_space<vmem>>, vector<32x128xbf16>
    %cst = arith.constant dense<0.000000e+00> : vector<8x128xf32>
    %3 = tpu.matmul %1, %2, %cst {dimension_numbers = #tpu.dot_dimension_numbers<[1], [0], [0], [1], [0, 0, 1, 1], [], []>} : vector<8x32xbf16>, vector<32x128xbf16>, vector<8x128xf32> -> vector<8x128xf32>
    %c0_3 = arith.constant 0 : index
    %c0_4 = arith.constant 0 : index
    %4 = vector.load %arg3[%c0_3, %c0_4] : memref<1x128xf32, #tpu.memory_space<vmem>>, vector<1x128xf32>
    %5 = vector.broadcast %4 : vector<1x128xf32> to vector<8x128xf32>
    %6 = arith.addf %3, %5 : vector<8x128xf32>
    %cst_5 = arith.constant 0.000000e+00 : f32
    %7 = vector.broadcast %cst_5 : f32 to vector<8x128xf32>
    %8 = arith.maximumf %6, %7 : vector<8x128xf32>
    %9 = arith.truncf %8 : vector<8x128xf32> to vector<8x128xbf16>
    %c0_6 = arith.constant 0 : index
    %c0_7 = arith.constant 0 : index
    %10 = vector.load %arg4[%c0_6, %c0_7] : memref<128x128xbf16, #tpu.memory_space<vmem>>, vector<128x128xbf16>
    %cst_8 = arith.constant dense<0.000000e+00> : vector<8x128xf32>
    %11 = tpu.matmul %9, %10, %cst_8 {dimension_numbers = #tpu.dot_dimension_numbers<[1], [0], [0], [1], [0, 0, 1, 1], [], []>} : vector<8x128xbf16>, vector<128x128xbf16>, vector<8x128xf32> -> vector<8x128xf32>
    %c0_9 = arith.constant 0 : index
    %c0_10 = arith.constant 0 : index
    %12 = vector.load %arg5[%c0_9, %c0_10] : memref<1x128xf32, #tpu.memory_space<vmem>>, vector<1x128xf32>
    %13 = vector.broadcast %12 : vector<1x128xf32> to vector<8x128xf32>
    %14 = arith.addf %11, %13 : vector<8x128xf32>
    %cst_11 = arith.constant 0.000000e+00 : f32
    %15 = vector.broadcast %cst_11 : f32 to vector<8x128xf32>
    %16 = arith.maximumf %14, %15 : vector<8x128xf32>
    %17 = arith.truncf %16 : vector<8x128xf32> to vector<8x128xbf16>
    %c0_12 = arith.constant 0 : index
    %c0_13 = arith.constant 0 : index
    %18 = vector.load %arg6[%c0_12, %c0_13] : memref<128x16xbf16, #tpu.memory_space<vmem>>, vector<128x16xbf16>
    %cst_14 = arith.constant dense<0.000000e+00> : vector<8x16xf32>
    %19 = tpu.matmul %17, %18, %cst_14 {dimension_numbers = #tpu.dot_dimension_numbers<[1], [0], [0], [1], [0, 0, 1, 1], [], []>} : vector<8x128xbf16>, vector<128x16xbf16>, vector<8x16xf32> -> vector<8x16xf32>
    %c0_15 = arith.constant 0 : index
    %c0_16 = arith.constant 0 : index
    %20 = vector.load %arg7[%c0_15, %c0_16] : memref<1x16xf32, #tpu.memory_space<vmem>>, vector<1x16xf32>
    %21 = vector.broadcast %20 : vector<1x16xf32> to vector<8x16xf32>
    %22 = arith.addf %19, %21 : vector<8x16xf32>
    %c0_17 = arith.constant 0 : index
    %c0_18 = arith.constant 0 : index
    %23 = vector.load %arg8[%c0_17, %c0_18] : memref<8x16xf32, #tpu.memory_space<vmem>>, vector<8x16xf32>
    tpu.vector_store %arg8[%c0_17, %c0_18], %22 {strides = array<i32>} : memref<8x16xf32, #tpu.memory_space<vmem>>, vector<8x16xf32>,
    return
  }
  func.func @transform_0(%arg0: i32) -> (i32, i32) {
    %c0_i32 = arith.constant 0 : i32
    %c0_i32_0 = arith.constant 0 : i32
    return %arg0, %c0_i32 : i32, i32
  }
  func.func @transform_1(%arg0: i32) -> (i32, i32) {
    %c0_i32 = arith.constant 0 : i32
    %c0_i32_0 = arith.constant 0 : i32
    %c0_i32_1 = arith.constant 0 : i32
    return %c0_i32, %c0_i32_0 : i32, i32
  }
  func.func @transform_2(%arg0: i32) -> (i32, i32) {
    %c0_i32 = arith.constant 0 : i32
    %c0_i32_0 = arith.constant 0 : i32
    %c0_i32_1 = arith.constant 0 : i32
    return %c0_i32, %c0_i32_0 : i32, i32
  }
  func.func @transform_3(%arg0: i32) -> (i32, i32) {
    %c0_i32 = arith.constant 0 : i32
    %c0_i32_0 = arith.constant 0 : i32
    %c0_i32_1 = arith.constant 0 : i32
    return %c0_i32, %c0_i32_0 : i32, i32
  }
  func.func @transform_4(%arg0: i32) -> (i32, i32) {
    %c0_i32 = arith.constant 0 : i32
    %c0_i32_0 = arith.constant 0 : i32
    %c0_i32_1 = arith.constant 0 : i32
    return %c0_i32, %c0_i32_0 : i32, i32
  }
  func.func @transform_5(%arg0: i32) -> (i32, i32) {
    %c0_i32 = arith.constant 0 : i32
    %c0_i32_0 = arith.constant 0 : i32
    %c0_i32_1 = arith.constant 0 : i32
    return %c0_i32, %c0_i32_0 : i32, i32
  }
  func.func @transform_6(%arg0: i32) -> (i32, i32) {
    %c0_i32 = arith.constant 0 : i32
    %c0_i32_0 = arith.constant 0 : i32
    %c0_i32_1 = arith.constant 0 : i32
    return %c0_i32, %c0_i32_0 : i32, i32
  }
  func.func @transform_7(%arg0: i32) -> (i32, i32) {
    %c0_i32 = arith.constant 0 : i32
    %c0_i32_0 = arith.constant 0 : i32
    return %arg0, %c0_i32 : i32, i32
  }
}

</mosaic_0001>

<bundles_post_ra>
// kernel: tpu_custom_call.1
= control target key start
LH: loop header
LB: loop body
LE: loop exit
PB: predicated region body
PF: predicated region fallthrough
CT: control target
= control target key end

     0   :  { %12 = vsyncpa [#allocation3], 0  ;;  %s686_s0 = inlined_call_operand.vmem [shape: f32[8,32], index: 0, kind: input, shape index: {}]   ;;  %s687_s1 = inlined_call_operand.hbm [shape: bf16[32,128], index: 1, kind: input, shape index: {}]   ;;  %s688_s2 = inlined_call_operand.vmem [shape: f32[1,128], index: 2, kind: input, shape index: {}]   ;;  %s689_s3 = inlined_call_operand.vmem [shape: bf16[128,128], index: 3, kind: input, shape index: {}]   ;;  %s690_s4 = inlined_call_operand.hbm [shape: f32[1,128], index: 4, kind: input, shape index: {}]   ;;  %s691_s5 = inlined_call_operand.vmem [shape: bf16[128,16], index: 5, kind: input, shape index: {}]   ;;  %s692_s6 = inlined_call_operand.vmem [shape: f32[1,16], index: 6, kind: input, shape index: {}]   ;;  %s693_s7 = inlined_call_operand.hbm [shape: f32[8,16], index: 7, kind: output, shape index: {}]  }
   0x1   :  { %13 = vsyncpa [#allocation6], 0 }
   0x2   :  { %14 = vsyncpa [#allocation4], 0  ;;  %s549_s24 = smov [#allocation2]  }
   0x3   :  { %s22_s25 = sshll.u32 %s549_s24, 4  ;;  %s23_s25 = int_to_ptr.vmem [resolvable:$true] %s22_s25 }
   0x4   :  { %s491_s26 = scalar_lea.vmem %s23_s25, 256  ;;  %p496_p1 = scmp.lt.s32.totalorder %s23_s25, %s23_s25 }
   0x5   :  { %p492_p0 = scmp.ne.s32.totalorder %s23_s25, %s491_s26  ;;  %p497_p2 = scmp.lt.s32.totalorder %s491_s26, %s491_s26 }
   0x7   :  { %p498_p3 = por %p497_p2, %p496_p1 }
   0x9   :  { %p499_p4 = pnand %p498_p3, %p492_p0 }
   0xb   :  { %502 = shalt.err (!%p499_p4)
}
   0xc   :  { %s550_s27 = smov 64   ;;  %s551_s28 = smov 4  }
   0xd   :  { %28 = dma.hbm_to_vmem [thread:$0]  %s687_s1, 256, %s23_s25, [#allocation3], %s550_s27, %s550_s27, %s551_s28  }
   0xe   :  { %s552_s8 = smov [#allocation5]  }
   0xf   :  { %s39_s9 = sshll.u32 %s552_s8, 4  ;;  %s40_s9 = int_to_ptr.vmem [resolvable:$true] %s39_s9 }
  0x10   :  { %s511_s10 = scalar_lea.vmem %s40_s9, 16  ;;  %s515_s11 = scalar_lea.vmem %s40_s9, 32 }
  0x11   :  { %p512_p5 = scmp.ne.s32.totalorder %s40_s9, %s511_s10  ;;  %p516_p6 = scmp.lt.s32.totalorder %s40_s9, %s40_s9 }
  0x12   :  { %p517_p7 = scmp.lt.s32.totalorder %s515_s11, %s511_s10 }
  0x14   :  { %p518_p8 = por %p517_p7, %p516_p6 }
  0x16   :  { %p519_p9 = pnand %p518_p8, %p512_p5 }
  0x18   :  { %522 = shalt.err (!%p519_p9)
}
  0x19   :  { %42 = dma.hbm_to_vmem [thread:$0]  %s690_s4, 16, %s40_s9, [#allocation6]  }
  0x1a   :  { %543 = dma.done.wait [#allocation3], 256  }
  0x1b   :  { %544 = vsyncadd [#allocation3], 4294967040 }
  0x1c   :  { %545 = dma.done.wait [#allocation6], 16  }
  0x1d   :  { %546 = vsyncadd [#allocation6], 4294967280  ;;  %v553_v0 = vmov 0.0   ;;  %vm554_vm0 = vmmov 0   ;;  %v465_v1 = vld [vmem:[#allocation2 + $0x8] sm:$0xff]   ;;  %v466_v2 = vld [vmem:[#allocation2] sm:$0xff]  }
  0x1e   :  { %410 = vmatprep.subr.bf16.mxu0 %v553_v0  ;;  %414 = vmatprep.mubr.msk.bf16.mxu0 %vm554_vm0, %v553_v0  ;;  %v54_v3 = vld [vmem:[%s686_s0] sm:$0xff]  ;;  %v467_v4 = vld [vmem:[%s689_s3 + $0x38] sm:$0xff]   ;;  %v468_v6 = vld [vmem:[%s689_s3 + $0x30] sm:$0xff]   ;;  %vm79_vm1 = vcmask 261120   ;;  %s555_s21 = smov [#allocation7]   ;;  %vm349_vm2 = vcmask 130048  }
  0x1f   :  { %418 = vmatprep.subr.bf16.mxu1 %v553_v0  ;;  %434 = vmatprep.mubr.msk.bf16.mxu1 %vm554_vm0, %v553_v0  ;;  %v55_v5 = vpack.c.bf16 %v54_v3, %v54_v3  ;;  %v469_v7 = vld [vmem:[%s689_s3 + $0x28] sm:$0xff]   ;;  %v470_v8 = vld [vmem:[%s689_s3 + $0x20] sm:$0xff]   ;;  %v471_v9 = vld [vmem:[%s689_s3 + $0x18] sm:$0xff]   ;;  %s357_s22 = sshll.u32 %s555_s21, 4  ;;  %s358_s22 = int_to_ptr.vmem [resolvable:$true] %s357_s22 }
  0x20   :  { %411 = vmatpush3.bf16.msra.mxu0 %v465_v1  ;;  %419 = vmatpush3.bf16.msra.mxu1 %v467_v4  ;;  %v472_v10 = vld [vmem:[%s689_s3 + $0x10] sm:$0xff]   ;;  %v473_v11 = vld [vmem:[%s689_s3 + $0x8] sm:$0xff]   ;;  %v474_v12 = vld [vmem:[%s689_s3] sm:$0xff]   ;;  %p528_p11 = scmp.lt.s32.totalorder %s358_s22, %s358_s22 }
  0x21   :  { %412 = vmatprep.subr.bf16.mxu0 %v553_v0  ;;  %420 = vmatprep.subr.bf16.mxu1 %v553_v0  ;;  %v475_v13 = vld [vmem:[%s691_s5 + $0x38] sm:$0xff]   ;;  %v476_v14 = vld [vmem:[%s691_s5 + $0x30] sm:$0xff]   ;;  %v477_v15 = vld [vmem:[%s691_s5 + $0x28] sm:$0xff]  }
  0x22   :  { %v478_v16 = vld [vmem:[%s691_s5 + $0x20] sm:$0xff]   ;;  %v479_v17 = vld [vmem:[%s691_s5 + $0x18] sm:$0xff]   ;;  %v480_v18 = vld [vmem:[%s691_s5 + $0x10] sm:$0xff]  }
  0x23   :  { %v367_v19 = vld [vmem:[%s688_s2] ss:$0 sm:$0xff]  ;;  %v481_v27 = vld [vmem:[%s691_s5 + $0x8] sm:$0xff]   ;;  %v371_v29 = vld [vmem:[#allocation5] ss:$0 sm:$0xff] }
  0x24   :  { %413 = vmatpush3.bf16.msra.mxu0 %v466_v2  ;;  %421 = vmatpush3.bf16.msra.mxu1 %v468_v6  ;;  %v482_v28 = vld [vmem:[%s691_s5] sm:$0xff]   ;;  %s523_s5 = scalar_lea.vmem %s358_s22, 128 }
  0x25   :  { %438 = vmatprep.subr.bf16.mxu0 %v553_v0  ;;  %422 = vmatprep.subr.bf16.mxu1 %v553_v0  ;;  %v380_v37 = vld [vmem:[%s692_s6] ss:$0 sm:$0xff]  ;;  %p524_p10 = scmp.ne.s32.totalorder %s358_s22, %s523_s5  ;;  %p529_p12 = scmp.lt.s32.totalorder %s523_s5, %s523_s5 }
  0x27   :  { %415 = vmatmul.mubr.msk.bf16.vlgmr.msra.gmra.mxu0 %vm79_vm1, %v55_v5  ;;  %p530_p13 = por %p529_p12, %p528_p11 }
  0x28   :  { %454 = vmatprep.mubr.msk.bf16.mxu0 %vm554_vm0, %v553_v0  ;;  %423 = vmatpush3.bf16.msra.mxu1 %v469_v7 }
  0x29   :  { %424 = vmatprep.subr.bf16.mxu1 %v553_v0  ;;  %439 = vmatpush3.bf16.msra.mxu0 %v475_v13  ;;  %p531_p0 = pnand %p530_p13, %p524_p10 }
  0x2a   :  { %440 = vmatprep.subr.bf16.mxu0 %v553_v0 }
  0x2c   :  { %425 = vmatpush3.bf16.msra.mxu1 %v470_v8 }
  0x2d   :  { %426 = vmatprep.subr.bf16.mxu1 %v553_v0  ;;  %441 = vmatpush3.bf16.msra.mxu0 %v476_v14 }
  0x2e   :  { %442 = vmatprep.subr.bf16.mxu0 %v553_v0 }
  0x30   :  { %427 = vmatpush3.bf16.msra.mxu1 %v471_v9 }
  0x31   :  { %428 = vmatprep.subr.bf16.mxu1 %v553_v0  ;;  %443 = vmatpush3.bf16.msra.mxu0 %v477_v15 }
  0x32   :  { %444 = vmatprep.subr.bf16.mxu0 %v553_v0 }
  0x34   :  { %429 = vmatpush3.bf16.msra.mxu1 %v472_v10 }
  0x35   :  { %430 = vmatprep.subr.bf16.mxu1 %v553_v0  ;;  %445 = vmatpush3.bf16.msra.mxu0 %v478_v16 }
  0x36   :  { %446 = vmatprep.subr.bf16.mxu0 %v553_v0 }
  0x38   :  { %431 = vmatpush3.bf16.msra.mxu1 %v473_v11 }
  0x39   :  { %432 = vmatprep.subr.bf16.mxu1 %v553_v0  ;;  %447 = vmatpush3.bf16.msra.mxu0 %v479_v17 }
  0x3a   :  { %448 = vmatprep.subr.bf16.mxu0 %v553_v0 }
  0x3c   :  { %433 = vmatpush3.bf16.msra.mxu1 %v474_v12 }
  0x3d   :  { %449 = vmatpush3.bf16.msra.mxu0 %v480_v18 }
  0x3e   :  { %450 = vmatprep.subr.bf16.mxu0 %v553_v0 }
  0x41   :  { %451 = vmatpush3.bf16.msra.mxu0 %v481_v27 }
  0x42   :  { %452 = vmatprep.subr.bf16.mxu0 %v553_v0 }
  0x45   :  { %453 = vmatpush3.bf16.msra.mxu0 %v482_v28 }
  0xe7   :  { %v117_v20 = vpop.f32.mrf.mxu0 }
  0xe8   :  { %v118_v21 = vadd.f32 %v367_v19, %v117_v20 }
  0xe9   :  { %v416_v22 = vpop.f32.mrf.mxu0 }
  0xea   :  { %v123_v23 = vmax.f32 %v118_v21, 0.0 }
  0xeb   :  { %v120_v24 = vpop.f32.mrf.mxu0 }
  0xec   :  { %v124_v25 = vpack.c.bf16 %v123_v23, %v123_v23 }
  0xed   :  { %v417_v26 = vpop.f32.mrf.mxu0 }
  0xee   :  { %435 = vmatmul.mubr.bf16.vlgmr.msra.gmra.mxu1 %v124_v25 }
 0x1ae   :  { %v230_v30 = vpop.f32.mrf.mxu1 }
 0x1af   :  { %v231_v31 = vadd.f32 %v371_v29, %v230_v30 }
 0x1b0   :  { %v436_v32 = vpop.f32.mrf.mxu1 }
 0x1b1   :  { %v236_v33 = vmax.f32 %v231_v31, 0.0 }
 0x1b2   :  { %v233_v34 = vpop.f32.mrf.mxu1 }
 0x1b3   :  { %v237_v35 = vpack.c.bf16 %v236_v33, %v236_v33 }
 0x1b4   :  { %v437_v36 = vpop.f32.mrf.mxu1 }
 0x1b5   :  { %455 = vmatmul.mubr.bf16.vlgmr.msra.gmra.mxu0 %v237_v35 }
 0x275   :  { %v343_v38 = vpop.f32.mrf.mxu0 }
 0x276   :  { %v344_v39 = vadd.f32 %v380_v37, %v343_v38 }
 0x277   :  { %v456_v40 = vpop.f32.mrf.mxu0 }
 0x278   :  { %350 = vst.msk [vmem:[#allocation7] sm:$0xff] %vm349_vm2, %v344_v39 }
 0x279   :  { %v346_v41 = vpop.f32.mrf.mxu0 }
 0x27a   :  { %534 = shalt.err (!%p531_p0)
}
 0x27b   :  { %360 = dma.vmem_to_hbm [thread:$0]  %s358_s22, 128, %s693_s7, [#allocation4]   ;;  %v457_v42 = vpop.f32.mrf.mxu0 }
 0x27c   :  { %547 = dma.done.wait [#allocation4], 128  }
 0x27d   :  { %548 = vsyncadd [#allocation4], 4294967168 }
 0x27e   :  { %364 = vsyncpa [#allocation3], 1 }
 0x27f   :  { %365 = vsyncpa [#allocation6], 1 }
 0x280   :  { %366 = vsyncpa [#allocation4], 1 }

</bundles_post_ra>
